<compile_context>
chip_gen: v7x
topology: tpu7x:2x2x1
jax: 0.10.0
libtpu: 0.0.40
codegen_flags: <defaults>
</compile_context>

<pallas_src>
import math

import jax
import jax.numpy as jnp
from jax import lax
from jax.experimental import pallas as pl
from jax.experimental.pallas import tpu as pltpu


_VMEM_LIMIT = 32 * 1024 * 1024  # safe on v5e/v6e (128 MiB phys) and v7x (64 MiB phys)


# ----------------------------------------------------------------------------
# Fused MHA kernel: one grid step per batch element.
# ----------------------------------------------------------------------------
def _make_mha_kernel(h, dh, d, inv_scale, mxu_dtype):
    def kernel(x_ref, wqkv_ref, bqkv_ref, wo_ref, bo_ref, o_ref):
        # x_ref:    (N, D)       activations for this batch element
        # wqkv_ref: (D, 3D)      repacked qkv weight, columns [ q | k | v ], heads
        #                        contiguous inside each third (resident in VMEM)
        # bqkv_ref: (1, 3D) f32  repacked qkv bias
        # wo_ref:   (D, D)       output projection weight (resident in VMEM)
        # bo_ref:   (1, D)  f32  output projection bias
        # o_ref:    (N, D)       lane-dense 'b n (h d)' output slab

        # --- QKV projection on the MXU, f32 accumulation, f32 bias add ---
        qkv = jnp.dot(x_ref[...], wqkv_ref[...], preferred_element_type=jnp.float32)
        qkv = (qkv + bqkv_ref[...]).astype(mxu_dtype)  # (N, 3D)

        # --- per-head attention (static Python loop, unrolled) ---
        outs = []
        for head in range(h):
            lo = head * dh
            q = qkv[:, lo:lo + dh]
            k = qkv[:, d + lo:d + lo + dh]
            v = qkv[:, 2 * d + lo:2 * d + lo + dh]

            # energy[i, j] = sum_c q[i, c] * k[j, c]  (contract head dim; no transpose)
            s = lax.dot_general(
                q, k, (((1,), (1,)), ((), ())),
                preferred_element_type=jnp.float32,
            )  # (N, N) f32

            # softmax in f32 (v5e has no bf16 VPU/EUP), then scale by 1/sqrt(D):
            # fold the scale into the per-row reciprocal so there's one multiply.
            m = jnp.max(s, axis=-1, keepdims=True)
            p = jnp.exp(s - m)
            denom = jnp.sum(p, axis=-1, keepdims=True)
            att = (p * (inv_scale / denom)).astype(mxu_dtype)

            outs.append(jnp.dot(att, v, preferred_element_type=jnp.float32))

        # Single lane-dense (N, D) slab in 'b n (h d)' order (no masked per-head stores).
        attn = jnp.concatenate(outs, axis=-1).astype(mxu_dtype)

        # --- output projection, fused (no HBM round trip for the attention output) ---
        out = jnp.dot(attn, wo_ref[...], preferred_element_type=jnp.float32)
        o_ref[...] = (out + bo_ref[...]).astype(o_ref.dtype)

    return kernel


# ----------------------------------------------------------------------------
# MHA forward (weight repack in plain JAX, hot path in one Pallas kernel)
# ----------------------------------------------------------------------------
def mha_forward(x, params, h, *, compute_dtype=jnp.bfloat16):
    B, N, D = x.shape
    assert D % h == 0, f"Cannot divide dim {D} into {h} heads."
    dh = D // h
    w_qkv, b_qkv, w_o, b_o = params
    cd = compute_dtype

    # Repack qkv weight columns (h, dh, 3) -> (3, h, dh): a one-time, tiny weight-side
    # transform that removes the stride-3 gather + two big activation transposes.
    w_qkv_p = (
        w_qkv.reshape(D, h, dh, 3).transpose(0, 3, 1, 2).reshape(D, 3 * D).astype(cd)
    )
    b_qkv_p = (
        b_qkv.reshape(h, dh, 3).transpose(2, 0, 1).reshape(1, 3 * D).astype(jnp.float32)
    )

    inv_scale = 1.0 / math.sqrt(float(D))

    return pl.pallas_call(
        _make_mha_kernel(h, dh, D, inv_scale, cd),
        out_shape=jax.ShapeDtypeStruct((B, N, D), x.dtype),
        grid=(B,),
        in_specs=[
            pl.BlockSpec((None, N, D), lambda b: (b, 0, 0)),   # x[b]       (pipelined)
            pl.BlockSpec((D, 3 * D), lambda b: (0, 0)),        # w_qkv      (resident)
            pl.BlockSpec((1, 3 * D), lambda b: (0, 0)),        # b_qkv      (resident)
            pl.BlockSpec((D, D), lambda b: (0, 0)),            # w_o        (resident)
            pl.BlockSpec((1, D), lambda b: (0, 0)),            # b_o        (resident)
        ],
        out_specs=pl.BlockSpec((None, N, D), lambda b: (b, 0, 0)),
        compiler_params=pltpu.CompilerParams(
            dimension_semantics=("parallel",),   # batch axis shards across TCs (megacore)
            vmem_limit_bytes=_VMEM_LIMIT,
        ),
    )(
        x.astype(cd),
        w_qkv_p,
        b_qkv_p,
        w_o.astype(cd),
        b_o.reshape(1, D).astype(jnp.float32),
    )


# ----------------------------------------------------------------------------
# Pure-JAX reference (mirrors the PyTorch module exactly)
# ----------------------------------------------------------------------------
def mha_reference(x, params, h):
    B, N, D = x.shape
    dh = D // h
    w_qkv, b_qkv, w_o, b_o = params
    qkv = x @ w_qkv + b_qkv
    qkv = qkv.reshape(B, N, h, dh, 3)
    q = jnp.transpose(qkv[..., 0], (0, 2, 1, 3))
    k = jnp.transpose(qkv[..., 1], (0, 2, 1, 3))
    v = jnp.transpose(qkv[..., 2], (0, 2, 1, 3))
    energy = jnp.einsum("bhqd,bhkd->bhqk", q, k)
    att = jax.nn.softmax(energy, axis=-1) / (D ** 0.5)
    out = jnp.einsum("bhal,bhlv->bhav", att, v)
    out = jnp.transpose(out, (0, 2, 1, 3)).reshape(B, N, D)
    return out @ w_o + b_o


def init_params(key, d):
    # Deterministic init matching nn.Linear's U(-1/sqrt(fan_in), 1/sqrt(fan_in)).
    k1, k2, k3, k4 = jax.random.split(key, 4)
    bound = 1.0 / math.sqrt(d)
    w_qkv = jax.random.uniform(k1, (d, 3 * d), jnp.float32, -bound, bound)
    b_qkv = jax.random.uniform(k2, (3 * d,), jnp.float32, -bound, bound)
    w_o = jax.random.uniform(k3, (d, d), jnp.float32, -bound, bound)
    b_o = jax.random.uniform(k4, (d,), jnp.float32, -bound, bound)
    return (w_qkv, b_qkv, w_o, b_o)


if __name__ == "__main__":
    B, N, D, H = 2, 8, 32, 4
    key = jax.random.PRNGKey(0)
    kx, kp = jax.random.split(key)
    x = jax.random.normal(kx, (B, N, D), jnp.float32)
    params = init_params(kp, D)

    ref = mha_reference(x, params, H)

    # Exact f32 path: validates semantics against the pure-JAX reference.
    out_f32 = jax.block_until_ready(mha_forward(x, params, H, compute_dtype=jnp.float32))
    assert out_f32.shape == (B, N, D)
    assert jnp.allclose(out_f32, ref, atol=1e-5, rtol=1e-5), "f32 mismatch vs reference"

    # bf16-MXU path (the fast path on v5e/v6e/v7x): looser, bf16-appropriate tolerance.
    out_bf16 = jax.block_until_ready(mha_forward(x, params, H, compute_dtype=jnp.bfloat16))
    assert out_bf16.shape == (B, N, D)
    assert jnp.allclose(out_bf16, ref, atol=5e-2, rtol=5e-2), "bf16 mismatch vs reference"

    print("KERNEL_OK")
</pallas_src>

<mosaic_0001>
module attributes {stable_mosaic.version = 11 : i64} {
  func.func @kernel(%arg0: i32, %arg1: memref<1x8x32xf32, #tpu.memory_space<vmem>>, %arg2: memref<32x96xf32, #tpu.memory_space<vmem>>, %arg3: memref<1x96xf32, #tpu.memory_space<vmem>>, %arg4: memref<32x32xf32, #tpu.memory_space<vmem>>, %arg5: memref<1x32xf32, #tpu.memory_space<vmem>>, %arg6: memref<1x8x32xf32, #tpu.memory_space<vmem>>) attributes {dimension_semantics = [#tpu.dimension_semantics<parallel>], iteration_bounds = array<i64: 2>, scalar_prefetch = 0 : i64, scratch_operands = 0 : i64, tpu.core_type = #tpu.core_type<tc>, window_params = [{transform_indices = @transform_0, window_bounds = array<i64: 1, 8, 32>}, {pipeline_mode = #tpu.pipeline_mode<synchronous>, transform_indices = @transform_1, window_bounds = array<i64: 32, 96>}, {pipeline_mode = #tpu.pipeline_mode<synchronous>, transform_indices = @transform_2, window_bounds = array<i64: 1, 96>}, {pipeline_mode = #tpu.pipeline_mode<synchronous>, transform_indices = @transform_3, window_bounds = array<i64: 32, 32>}, {pipeline_mode = #tpu.pipeline_mode<synchronous>, transform_indices = @transform_4, window_bounds = array<i64: 1, 32>}, {transform_indices = @transform_5, window_bounds = array<i64: 1, 8, 32>}]} {
    %c0 = arith.constant 0 : index
    %c0_0 = arith.constant 0 : index
    %c0_1 = arith.constant 0 : index
    %0 = vector.load %arg1[%c0, %c0_0, %c0_1] : memref<1x8x32xf32, #tpu.memory_space<vmem>>, vector<1x8x32xf32>
    %1 = vector.shape_cast %0 : vector<1x8x32xf32> to vector<8x32xf32>
    %c0_2 = arith.constant 0 : index
    %c0_3 = arith.constant 0 : index
    %2 = vector.load %arg2[%c0_2, %c0_3] : memref<32x96xf32, #tpu.memory_space<vmem>>, vector<32x96xf32>
    %cst = arith.constant dense<0.000000e+00> : vector<8x96xf32>
    %3 = tpu.matmul %1, %2, %cst {dimension_numbers = #tpu.dot_dimension_numbers<[1], [0], [0], [1], [0, 0, 1, 1], [], []>} : vector<8x32xf32>, vector<32x96xf32>, vector<8x96xf32> -> vector<8x96xf32>
    %c0_4 = arith.constant 0 : index
    %c0_5 = arith.constant 0 : index
    %4 = vector.load %arg3[%c0_4, %c0_5] : memref<1x96xf32, #tpu.memory_space<vmem>>, vector<1x96xf32>
    %5 = vector.broadcast %4 : vector<1x96xf32> to vector<8x96xf32>
    %6 = arith.addf %3, %5 : vector<8x96xf32>
    %7 = vector.extract_strided_slice %6 {offsets = [0, 0], sizes = [8, 8], strides = [1, 1]} : vector<8x96xf32> to vector<8x8xf32>
    %8 = vector.extract_strided_slice %6 {offsets = [0, 32], sizes = [8, 8], strides = [1, 1]} : vector<8x96xf32> to vector<8x8xf32>
    %9 = vector.extract_strided_slice %6 {offsets = [0, 64], sizes = [8, 8], strides = [1, 1]} : vector<8x96xf32> to vector<8x8xf32>
    %cst_6 = arith.constant dense<0.000000e+00> : vector<8x8xf32>
    %10 = tpu.matmul %7, %8, %cst_6 {dimension_numbers = #tpu.dot_dimension_numbers<[1], [1], [0], [0], [0, 0, 1, 0], [], []>} : vector<8x8xf32>, vector<8x8xf32>, vector<8x8xf32> -> vector<8x8xf32>
    %cst_7 = arith.constant dense<0xFF800000> : vector<8xf32>
    %11 = vector.multi_reduction <maximumf>, %10, %cst_7 [1] : vector<8x8xf32> to vector<8xf32>
    %12 = vector.shape_cast %11 : vector<8xf32> to vector<8x1xf32>
    %13 = vector.broadcast %12 : vector<8x1xf32> to vector<8x8xf32>
    %14 = arith.subf %10, %13 : vector<8x8xf32>
    %15 = math.exp %14 : vector<8x8xf32>
    %cst_8 = arith.constant dense<0.000000e+00> : vector<8xf32>
    %16 = vector.multi_reduction <add>, %15, %cst_8 [1] : vector<8x8xf32> to vector<8xf32>
    %17 = vector.shape_cast %16 : vector<8xf32> to vector<8x1xf32>
    %cst_9 = arith.constant 0.176776692 : f32
    %18 = vector.broadcast %cst_9 : f32 to vector<8x1xf32>
    %19 = arith.divf %18, %17 : vector<8x1xf32>
    %20 = vector.broadcast %19 : vector<8x1xf32> to vector<8x8xf32>
    %21 = arith.mulf %15, %20 : vector<8x8xf32>
    %cst_10 = arith.constant dense<0.000000e+00> : vector<8x8xf32>
    %22 = tpu.matmul %21, %9, %cst_10 {dimension_numbers = #tpu.dot_dimension_numbers<[1], [0], [0], [1], [0, 0, 1, 1], [], []>} : vector<8x8xf32>, vector<8x8xf32>, vector<8x8xf32> -> vector<8x8xf32>
    %23 = vector.extract_strided_slice %6 {offsets = [0, 8], sizes = [8, 8], strides = [1, 1]} : vector<8x96xf32> to vector<8x8xf32>
    %24 = vector.extract_strided_slice %6 {offsets = [0, 40], sizes = [8, 8], strides = [1, 1]} : vector<8x96xf32> to vector<8x8xf32>
    %25 = vector.extract_strided_slice %6 {offsets = [0, 72], sizes = [8, 8], strides = [1, 1]} : vector<8x96xf32> to vector<8x8xf32>
    %cst_11 = arith.constant dense<0.000000e+00> : vector<8x8xf32>
    %26 = tpu.matmul %23, %24, %cst_11 {dimension_numbers = #tpu.dot_dimension_numbers<[1], [1], [0], [0], [0, 0, 1, 0], [], []>} : vector<8x8xf32>, vector<8x8xf32>, vector<8x8xf32> -> vector<8x8xf32>
    %cst_12 = arith.constant dense<0xFF800000> : vector<8xf32>
    %27 = vector.multi_reduction <maximumf>, %26, %cst_12 [1] : vector<8x8xf32> to vector<8xf32>
    %28 = vector.shape_cast %27 : vector<8xf32> to vector<8x1xf32>
    %29 = vector.broadcast %28 : vector<8x1xf32> to vector<8x8xf32>
    %30 = arith.subf %26, %29 : vector<8x8xf32>
    %31 = math.exp %30 : vector<8x8xf32>
    %cst_13 = arith.constant dense<0.000000e+00> : vector<8xf32>
    %32 = vector.multi_reduction <add>, %31, %cst_13 [1] : vector<8x8xf32> to vector<8xf32>
    %33 = vector.shape_cast %32 : vector<8xf32> to vector<8x1xf32>
    %cst_14 = arith.constant 0.176776692 : f32
    %34 = vector.broadcast %cst_14 : f32 to vector<8x1xf32>
    %35 = arith.divf %34, %33 : vector<8x1xf32>
    %36 = vector.broadcast %35 : vector<8x1xf32> to vector<8x8xf32>
    %37 = arith.mulf %31, %36 : vector<8x8xf32>
    %cst_15 = arith.constant dense<0.000000e+00> : vector<8x8xf32>
    %38 = tpu.matmul %37, %25, %cst_15 {dimension_numbers = #tpu.dot_dimension_numbers<[1], [0], [0], [1], [0, 0, 1, 1], [], []>} : vector<8x8xf32>, vector<8x8xf32>, vector<8x8xf32> -> vector<8x8xf32>
    %39 = vector.extract_strided_slice %6 {offsets = [0, 16], sizes = [8, 8], strides = [1, 1]} : vector<8x96xf32> to vector<8x8xf32>
    %40 = vector.extract_strided_slice %6 {offsets = [0, 48], sizes = [8, 8], strides = [1, 1]} : vector<8x96xf32> to vector<8x8xf32>
    %41 = vector.extract_strided_slice %6 {offsets = [0, 80], sizes = [8, 8], strides = [1, 1]} : vector<8x96xf32> to vector<8x8xf32>
    %cst_16 = arith.constant dense<0.000000e+00> : vector<8x8xf32>
    %42 = tpu.matmul %39, %40, %cst_16 {dimension_numbers = #tpu.dot_dimension_numbers<[1], [1], [0], [0], [0, 0, 1, 0], [], []>} : vector<8x8xf32>, vector<8x8xf32>, vector<8x8xf32> -> vector<8x8xf32>
    %cst_17 = arith.constant dense<0xFF800000> : vector<8xf32>
    %43 = vector.multi_reduction <maximumf>, %42, %cst_17 [1] : vector<8x8xf32> to vector<8xf32>
    %44 = vector.shape_cast %43 : vector<8xf32> to vector<8x1xf32>
    %45 = vector.broadcast %44 : vector<8x1xf32> to vector<8x8xf32>
    %46 = arith.subf %42, %45 : vector<8x8xf32>
    %47 = math.exp %46 : vector<8x8xf32>
    %cst_18 = arith.constant dense<0.000000e+00> : vector<8xf32>
    %48 = vector.multi_reduction <add>, %47, %cst_18 [1] : vector<8x8xf32> to vector<8xf32>
    %49 = vector.shape_cast %48 : vector<8xf32> to vector<8x1xf32>
    %cst_19 = arith.constant 0.176776692 : f32
    %50 = vector.broadcast %cst_19 : f32 to vector<8x1xf32>
    %51 = arith.divf %50, %49 : vector<8x1xf32>
    %52 = vector.broadcast %51 : vector<8x1xf32> to vector<8x8xf32>
    %53 = arith.mulf %47, %52 : vector<8x8xf32>
    %cst_20 = arith.constant dense<0.000000e+00> : vector<8x8xf32>
    %54 = tpu.matmul %53, %41, %cst_20 {dimension_numbers = #tpu.dot_dimension_numbers<[1], [0], [0], [1], [0, 0, 1, 1], [], []>} : vector<8x8xf32>, vector<8x8xf32>, vector<8x8xf32> -> vector<8x8xf32>
    %55 = vector.extract_strided_slice %6 {offsets = [0, 24], sizes = [8, 8], strides = [1, 1]} : vector<8x96xf32> to vector<8x8xf32>
    %56 = vector.extract_strided_slice %6 {offsets = [0, 56], sizes = [8, 8], strides = [1, 1]} : vector<8x96xf32> to vector<8x8xf32>
    %57 = vector.extract_strided_slice %6 {offsets = [0, 88], sizes = [8, 8], strides = [1, 1]} : vector<8x96xf32> to vector<8x8xf32>
    %cst_21 = arith.constant dense<0.000000e+00> : vector<8x8xf32>
    %58 = tpu.matmul %55, %56, %cst_21 {dimension_numbers = #tpu.dot_dimension_numbers<[1], [1], [0], [0], [0, 0, 1, 0], [], []>} : vector<8x8xf32>, vector<8x8xf32>, vector<8x8xf32> -> vector<8x8xf32>
    %cst_22 = arith.constant dense<0xFF800000> : vector<8xf32>
    %59 = vector.multi_reduction <maximumf>, %58, %cst_22 [1] : vector<8x8xf32> to vector<8xf32>
    %60 = vector.shape_cast %59 : vector<8xf32> to vector<8x1xf32>
    %61 = vector.broadcast %60 : vector<8x1xf32> to vector<8x8xf32>
    %62 = arith.subf %58, %61 : vector<8x8xf32>
    %63 = math.exp %62 : vector<8x8xf32>
    %cst_23 = arith.constant dense<0.000000e+00> : vector<8xf32>
    %64 = vector.multi_reduction <add>, %63, %cst_23 [1] : vector<8x8xf32> to vector<8xf32>
    %65 = vector.shape_cast %64 : vector<8xf32> to vector<8x1xf32>
    %cst_24 = arith.constant 0.176776692 : f32
    %66 = vector.broadcast %cst_24 : f32 to vector<8x1xf32>
    %67 = arith.divf %66, %65 : vector<8x1xf32>
    %68 = vector.broadcast %67 : vector<8x1xf32> to vector<8x8xf32>
    %69 = arith.mulf %63, %68 : vector<8x8xf32>
    %cst_25 = arith.constant dense<0.000000e+00> : vector<8x8xf32>
    %70 = tpu.matmul %69, %57, %cst_25 {dimension_numbers = #tpu.dot_dimension_numbers<[1], [0], [0], [1], [0, 0, 1, 1], [], []>} : vector<8x8xf32>, vector<8x8xf32>, vector<8x8xf32> -> vector<8x8xf32>
    %71 = tpu.concatenate %22, %38, %54, %70 in 1 : vector<8x8xf32>, vector<8x8xf32>, vector<8x8xf32>, vector<8x8xf32> -> vector<8x32xf32>
    %c0_26 = arith.constant 0 : index
    %c0_27 = arith.constant 0 : index
    %72 = vector.load %arg4[%c0_26, %c0_27] : memref<32x32xf32, #tpu.memory_space<vmem>>, vector<32x32xf32>
    %cst_28 = arith.constant dense<0.000000e+00> : vector<8x32xf32>
    %73 = tpu.matmul %71, %72, %cst_28 {dimension_numbers = #tpu.dot_dimension_numbers<[1], [0], [0], [1], [0, 0, 1, 1], [], []>} : vector<8x32xf32>, vector<32x32xf32>, vector<8x32xf32> -> vector<8x32xf32>
    %c0_29 = arith.constant 0 : index
    %c0_30 = arith.constant 0 : index
    %74 = vector.load %arg5[%c0_29, %c0_30] : memref<1x32xf32, #tpu.memory_space<vmem>>, vector<1x32xf32>
    %75 = vector.broadcast %74 : vector<1x32xf32> to vector<8x32xf32>
    %76 = arith.addf %73, %75 : vector<8x32xf32>
    %c0_31 = arith.constant 0 : index
    %c0_32 = arith.constant 0 : index
    %c0_33 = arith.constant 0 : index
    %77 = vector.load %arg6[%c0_31, %c0_32, %c0_33] : memref<1x8x32xf32, #tpu.memory_space<vmem>>, vector<1x8x32xf32>
    %78 = vector.shape_cast %77 : vector<1x8x32xf32> to vector<8x32xf32>
    %79 = vector.shape_cast %76 : vector<8x32xf32> to vector<1x8x32xf32>
    tpu.vector_store %arg6[%c0_31, %c0_32, %c0_33], %79 {strides = array<i32>} : memref<1x8x32xf32, #tpu.memory_space<vmem>>, vector<1x8x32xf32>,
    return
  }
  func.func @transform_0(%arg0: i32) -> (i32, i32, i32) {
    %c0_i32 = arith.constant 0 : i32
    %c0_i32_0 = arith.constant 0 : i32
    %c0_i32_1 = arith.constant 0 : i32
    return %arg0, %c0_i32, %c0_i32_0 : i32, i32, i32
  }
  func.func @transform_1(%arg0: i32) -> (i32, i32) {
    %c0_i32 = arith.constant 0 : i32
    %c0_i32_0 = arith.constant 0 : i32
    %c0_i32_1 = arith.constant 0 : i32
    return %c0_i32, %c0_i32_0 : i32, i32
  }
  func.func @transform_2(%arg0: i32) -> (i32, i32) {
    %c0_i32 = arith.constant 0 : i32
    %c0_i32_0 = arith.constant 0 : i32
    %c0_i32_1 = arith.constant 0 : i32
    return %c0_i32, %c0_i32_0 : i32, i32
  }
  func.func @transform_3(%arg0: i32) -> (i32, i32) {
    %c0_i32 = arith.constant 0 : i32
    %c0_i32_0 = arith.constant 0 : i32
    %c0_i32_1 = arith.constant 0 : i32
    return %c0_i32, %c0_i32_0 : i32, i32
  }
  func.func @transform_4(%arg0: i32) -> (i32, i32) {
    %c0_i32 = arith.constant 0 : i32
    %c0_i32_0 = arith.constant 0 : i32
    %c0_i32_1 = arith.constant 0 : i32
    return %c0_i32, %c0_i32_0 : i32, i32
  }
  func.func @transform_5(%arg0: i32) -> (i32, i32, i32) {
    %c0_i32 = arith.constant 0 : i32
    %c0_i32_0 = arith.constant 0 : i32
    %c0_i32_1 = arith.constant 0 : i32
    return %arg0, %c0_i32, %c0_i32_0 : i32, i32, i32
  }
}

</mosaic_0001>

<bundles_post_ra>
// kernel: tpu_custom_call.1
= control target key start
LH: loop header
LB: loop body
LE: loop exit
PB: predicated region body
PF: predicated region fallthrough
CT: control target
= control target key end

     0   :  { %10 = vsyncpa [#allocation3], 0  ;;  %s1981_s0 = inlined_call_operand.hbm [shape: f32[2,8,32], index: 0, kind: input, shape index: {}]   ;;  %s1982_s1 = inlined_call_operand.hbm [shape: f32[32,96], index: 1, kind: input, shape index: {}]   ;;  %s1983_s2 = inlined_call_operand.vmem [shape: f32[1,96], index: 2, kind: input, shape index: {}]   ;;  %s1984_s3 = inlined_call_operand.hbm [shape: f32[32,32], index: 3, kind: input, shape index: {}]   ;;  %s1985_s4 = inlined_call_operand.vmem [shape: f32[1,32], index: 4, kind: input, shape index: {}]   ;;  %s1986_s5 = inlined_call_operand.hbm [shape: f32[2,8,32], index: 5, kind: output, shape index: {}]  }
   0x1   :  { %12 = vsyncpa [#allocation3 + $0x1], 0 }
   0x2   :  { %13 = vsyncpa [#allocation6], 0 }
   0x3   :  { %14 = vsyncpa [#allocation4], 0 }
   0x4   :  { %16 = vsyncpa [#allocation4 + $0x1], 0  ;;  %s1669_s18 = smov 0   ;;  %s1671_s19 = smov 0  }
   0x5   :  { %s1673_s20 = smov 0   ;;  %s1675_s21 = smov 0  }
   0x6 LB: > { %s1690_s22 = sadd.s32 4294967295, %s1614_s21   ;;  %s1224_s23 = sadd.s32 4294967294, %s1614_s21   ;;  %s1614_s21 = sphi %s1675_s21, %s2006_s21   ;;  %s1610_s20 = sphi %s1673_s20, %s2005_s20   ;;  %s1606_s19 = sphi %s1671_s19, %s2004_s19   ;;  %s1602_s18 = sphi %s1669_s18, %s2003_s18  }
   0x7   : > { %p42_p0 = scmp.ne.s32.totalorder %s1606_s19, %s1602_s18  ;;  %p1987_p1 = scmp.eq.s32.totalorder %s1690_s22, 0 }
   0x8   : > { %p156_p3 = scmp.eq.s32.totalorder %s1224_s23, 1  ;;  %p1225_p5 = scmp.ge.s32.totalorder %s1614_s21, 1 }
   0x9   : > { %p1699_p4 = por %p1987_p1, %p42_p0  ;;  %p163_p7 = scmp.lt.s32.totalorder %s1614_s21, 3 }
   0xa   : > { %p1704_p6 = por %p156_p3, %p42_p0  ;;  %s1616_s27 = smov [#allocation5]  }
   0xb   : > { %s1990_s24 = scalar_select %p1699_p4, 1, 0 }
   0xc   : > { %s1991_s25 = scalar_select %p1704_p6, 1, 0 }
   0xd   : > { %p1709_p8 = pnand %p1225_p5, %p163_p7  ;;  %s175_s28 = sshll.u32 %s1616_s27, 4  ;;  %s1713_s28 = int_to_ptr.vmem [resolvable:$true] %s175_s28 }
   0xe   : > { %s1617_s30 = smov [#allocation7]   ;;  %s1458_s9 = scalar_lea.hbm %s1982_s1, 512 }
   0xf   : > { %p1368_p9 = pneg %p1709_p8  ;;  %s191_s6 = sshll.u32 %s1617_s30, 4  ;;  %s1724_s6 = int_to_ptr.vmem [resolvable:$true] %s191_s6 }
  0x10   : > { %p1459_p12 = scmp.ne.s32.totalorder %s1982_s1, %s1458_s9  ;;  %p1465_p5 = scmp.lt.u32.totalorder %s1458_s9, %s1982_s1 }
  0x11   : > { %p1720_p11 = pnand %p1368_p9, %p1987_p1 }
  0x13   : > { %p1460_p13 = pneg %p1720_p11 }
  0x15   : > { %p1461_p0 = pnand %p1460_p13, %p1459_p12 }
  0x17   : > { %p1462_p3 = pneg %p1461_p0 }
  0x19   : > { %p1467_p7 = pnand %p1465_p5, %p1462_p3 }
  0x1b   : > { %1470 = shalt.err (!%p1467_p7)
}
  0x1c   : > { %s1471_s14 = scalar_lea.vmem %s1713_s28, 512  ;;  %p1479_p2 = scmp.lt.s32.totalorder %s1713_s28, %s1713_s28 }
  0x1d   : > { %p1472_p9 = scmp.ne.s32.totalorder %s1713_s28, %s1471_s14  ;;  %p1480_p12 = scmp.lt.s32.totalorder %s1471_s14, %s1471_s14 }
  0x1f   : > { %p1474_p10 = pnand %p1472_p9, %p1460_p13  ;;  %p1481_p0 = por %p1480_p12, %p1479_p2 }
  0x21   : > { %p1475_p1 = pneg %p1474_p10 }
  0x23   : > { %p1482_p6 = pnand %p1481_p0, %p1475_p1 }
  0x25   : > { %1485 = shalt.err (!%p1482_p6)
}
  0x26   : > { %s1618_s15 = smov 128   ;;  %s1619_s16 = smov 8  }
  0x27   : > { %1371 = dma.hbm_to_vmem [thread:$0]  (!%p1720_p11), %s1982_s1, 512, %s1713_s28, [#allocation6], %s1618_s15, %s1618_s15, %s1619_s16  }
  0x28   : > { %s1486_s7 = scalar_lea.hbm %s1984_s3, 512 }
  0x29   : > { %p1487_p2 = scmp.ne.s32.totalorder %s1984_s3, %s1486_s7  ;;  %p1493_p10 = scmp.lt.u32.totalorder %s1486_s7, %s1984_s3 }
  0x2b   : > { %p1489_p1 = pnand %p1487_p2, %p1460_p13 }
  0x2d   : > { %p1490_p6 = pneg %p1489_p1 }
  0x2f   : > { %p1495_p3 = pnand %p1493_p10, %p1490_p6 }
  0x31   : > { %1498 = shalt.err (!%p1495_p3)
}
  0x32   : > { %s1499_s28 = scalar_lea.vmem %s1724_s6, 512  ;;  %p1507_p12 = scmp.lt.s32.totalorder %s1724_s6, %s1724_s6 }
  0x33   : > { %p1500_p5 = scmp.ne.s32.totalorder %s1724_s6, %s1499_s28  ;;  %p1508_p0 = scmp.lt.s32.totalorder %s1499_s28, %s1499_s28 }
  0x35   : > { %p1502_p7 = pnand %p1500_p5, %p1460_p13  ;;  %p1509_p2 = por %p1508_p0, %p1507_p12 }
  0x37   : > { %p1503_p9 = pneg %p1502_p7 }
  0x39   : > { %p1510_p1 = pnand %p1509_p2, %p1503_p9 }
  0x3b   : > { %1513 = shalt.err (!%p1510_p1)
}
  0x3c   : > { %1374 = dma.hbm_to_vmem [thread:$0]  (!%p1720_p11), %s1984_s3, 512, %s1724_s6, [#allocation6], %s1618_s15, %s1618_s15, %s1619_s16  }
  0x3d   : > { %s1779_s14 = sadd.s32 1, %s1614_s21   ;;  %s29_s29 = sadd.s32 1, %s1610_s20 }
  0x3e   : > { %s26_s17 = ssub.s32 %s1614_s21, %s1779_s14  ;;  %p36_p13 = scmp.ne.s32.totalorder %s1610_s20, %s1606_s19 }
  0x3f   : > { %p27_p6 = scmp.eq.s32.totalorder %s26_s17, 0  ;;  %p37_p10 = scmp.eq.s32.totalorder %s1614_s21, 0 }
  0x40   : > { %p1994_p3 = scmp.eq.s32.totalorder %s1690_s22, 1  ;;  %p1385_p7 = scmp.lt.s32.totalorder %s1614_s21, 2 }
  0x41   : > { %s1795_s27 = scalar_select %p27_p6, %s1610_s20, %s29_s29  }
  0x42   : > { %p1789_p5 = por %p1994_p3, %p36_p13  ;;  %p38_p9 = por %p37_p10, %p36_p13 }
  0x43   : > { %s208_s30 = sand.u32 1, %s1610_s20   ;;  %s1230_s6 = sshll.u32 %s1614_s21, 7 }
  0x44   : > { %s1995_s23 = scalar_select %p1789_p5, 1, 0 }
  0x45   : > { %s1229_s7 = sshll.u32 %s208_s30, 3  ;;  %s1802_s8 = scalar_lea.hbm %s1981_s0, %s1230_s6 }
  0x46   : > { %s212_s9 = scalar_lea.vmem [#allocation2], %s1229_s7  ;;  %p1806_p11 = pnand %p1385_p7, %p38_p9 }
  0x47   : > { %s219_s10 = sshll.u32 %s212_s9, 4  ;;  %s209_s28 = scalar_lea.sflag [#allocation3], %s208_s30  ;;  %s1804_s10 = int_to_ptr.vmem [resolvable:$true] %s219_s10 }
  0x48   : > { %s1514_s12 = scalar_lea.hbm %s1802_s8, 128  ;;  %p1516_p0 = pneg %p1806_p11 }
  0x49   : > { %p1515_p12 = scmp.ne.s32.totalorder %s1802_s8, %s1514_s12  ;;  %s1519_s17 = scalar_lea.hbm %s1981_s0, 256 }
  0x4a   : > { %p1520_p13 = scmp.lt.u32.totalorder %s1802_s8, %s1981_s0  ;;  %p1521_p6 = scmp.lt.u32.totalorder %s1519_s17, %s1514_s12 }
  0x4b   : > { %p1517_p2 = pnand %p1516_p0, %p1515_p12  ;;  %p1523_p3 = scmp.lt.u32.totalorder %s1514_s12, %s1802_s8 }
  0x4c   : > { %p1522_p10 = por %p1521_p6, %p1520_p13 }
  0x4d   : > { %p1518_p1 = pneg %p1517_p2 }
  0x4e   : > { %p1524_p7 = por %p1523_p3, %p1522_p10 }
  0x50   : > { %p1525_p9 = pnand %p1524_p7, %p1518_p1 }
  0x52   : > { %1528 = shalt.err (!%p1525_p9)
}
  0x53   : > { %s1529_s30 = scalar_lea.vmem %s1804_s10, 128  ;;  %s1620_s15 = smov [#allocation2]  }
  0x54   : > { %p1530_p12 = scmp.ne.s32.totalorder %s1804_s10, %s1529_s30  ;;  %s1534_s16 = sshll.u32 %s1620_s15, 4  ;;  %s1535_s16 = int_to_ptr.vmem [resolvable:$false] %s1534_s16 }
  0x55   : > { %s1536_s9 = scalar_lea.vmem %s1535_s16, 256  ;;  %p1537_p4 = scmp.lt.s32.totalorder %s1804_s10, %s1535_s16 }
  0x56   : > { %p1532_p2 = pnand %p1530_p12, %p1516_p0  ;;  %p1538_p13 = scmp.lt.s32.totalorder %s1536_s9, %s1529_s30 }
  0x58   : > { %p1533_p5 = pneg %p1532_p2  ;;  %p1539_p6 = por %p1538_p13, %p1537_p4 }
  0x5a   : > { %p1540_p10 = pnand %p1539_p6, %p1533_p5 }
  0x5c   : > { %1543 = shalt.err (!%p1540_p10)
}
  0x5d   : > { %1378 = dma.hbm_to_vmem [thread:$0]  (!%p1806_p11), %s1802_s8, 128, %s1804_s10, %s209_s28  }
  0x5e   : > { %228 = sbr.rel (%p1709_p8) target bundleno = 2113 (0x841), region = 40  ;;  %s1838_s12 = sand.u32 (!%p1709_p8), 1, %s1606_s19  }
  0x5f   : > { %s1232_s13 = sshll.u32 (!%p1709_p8), %s1838_s12, 3  ;;  %s231_s29 = scalar_lea.sflag (!%p1709_p8), [#allocation3], %s1838_s12 }
  0x60   : > { %s234_s17 = scalar_lea.vmem (!%p1709_p8), [#allocation2], %s1232_s13  ;;  %p1997_p4 = scmp.ne.s32.totalorder (!%p1709_p8), %s1990_s24, 0 }
  0x65   : > { %1589 = dma.done.wait (%p1997_p4), %s231_s29, 128  }
  0x66   : > { %1591 = vsyncadd (%p1997_p4), %s231_s29, 4294967168  ;;  %p1998_p5 = scmp.eq.s32.totalorder %s1690_s22, 0 }
  0x68   : > { %1593 = dma.done.wait (%p1998_p5), [#allocation6], 1024   ;;  %p1999_p8 = pmov %p1998_p5 }
  0x69   : > { %v1621_v0 = vmov 0.0|0.0   ;;  %vm1622_vm0 = vmmov 0   ;;  %v1623_v1 = vmov 0.0   ;;  %v270_v2 = vld [vmem:[#allocation5] sm:$0xff]  ;;  %v271_v3 = vld [vmem:[#allocation5 + $0x8] sm:$0xff]  ;;  %v272_v4 = vld [vmem:[#allocation5 + $0x10] sm:$0xff] }
  0x6a   : > { %1595 = vsyncadd (%p1999_p8), [#allocation6], 4294966272  ;;  %1344 = vmatprep.subr.bf16.mxu0 %v1621_v0  ;;  %1290 = vmatprep.mubr.msk.f32.mxu0 %vm1622_vm0, %v1623_v1  ;;  %v1345_v5 = vpack.c.bf16 %v271_v3, %v270_v2  ;;  %v273_v6 = vld [vmem:[#allocation5 + $0x18] sm:$0xff]  ;;  %vm281_vm1 = vcmask 261120   ;;  %v1236_v9 = vld [vmem:[%s1983_s2] ss:$0 sm:$0xff] }
  0x6b   : > { %1293 = vmatprep.subr.mxu1 %v1623_v1  ;;  %1295 = vmatprep.mubr.msk.f32.mxu1 %vm1622_vm0, %v1623_v1  ;;  %v1348_v7 = vpack.c.bf16 %v273_v6, %v272_v4  ;;  %v269_v8 = vld [vmem:[%s234_s17] sm:$0xff]  ;;  %s1624_s8 = smov 64   ;;  %s1625_s10 = smov 96   ;;  %vm358_vm2 = vcmask 64512   ;;  %vm1032_vm3 = vcmask 130048   ;;  %vm1034_vm4 = vcmask 195584  }
  0x6c   : > { %1346 = vmatpush3.bf16.msra.mxu0 %v1345_v5  ;;  %s1626_s11 = smov 88   ;;  %s1627_s28 = smov 120  }
  0x6d   : > { %1347 = vmatprep.subr.bf16.mxu0 %v1621_v0  ;;  %s1628_s7 = smov 72   ;;  %s1629_s6 = smov 80  }
  0x6e   : > { %s1630_s30 = smov 112   ;;  %s1631_s15 = smov 104  }
  0x6f   : > { %s1632_s16 = smov 56   ;;  %s1633_s9 = smov 48  }
  0x70   : > { %1349 = vmatpush3.bf16.msra.mxu0 %v1348_v7  ;;  %s1634_s29 = smov 40   ;;  %s1635_s17 = smov 8  }
  0x71   : > { %1313 = vmatprep.subr.mxu0 %v1623_v1  ;;  %s1636_s24 = smov 16   ;;  %s1637_s26 = smov 24  }
  0x72   : > { %p2000_p0 = scmp.ne.s32.totalorder %s1995_s23, 0 }
  0x73   : > { %1291 = vmatmul.mubr.msk.f32.vlgmr.msra.gmra.mrb[0].mxu0 %vm281_vm1, %v269_v8 }
  0x74   : > { %1315 = vmatprep.mubr.msk.f32.mxu0 %vm1622_vm0, %v1623_v1 }
 0x146   : > { %v351_v10 = vpop.f32.mrb[0].mxu0 }
 0x147   : > { %v1866_v11 = vadd.f32 %v1236_v9, %v351_v10  ;;  %v1292_v12 = vpop.f32.mrb[1].mxu0 }
 0x148   : > { %v1036_v12 = vld [vmem:[#allocation7] sm:$0xff] }
 0x149   : > { %445 = vrot.lane.b32.xlu1 %v1866_v11, %s1624_s8  ;;  %356 = vrot.lane.b32.xlu0 %v1866_v11, %s1625_s10 }
 0x14d   : > { %523 = vrot.lane.b32.xlu1 %v1866_v11, %s1626_s11  ;;  %s1253_s11 = sshll.u32 %s1690_s22, 7 }
 0x151   : > { %521 = vrot.lane.b32.xlu1 %v1866_v11, %s1627_s28  ;;  %s268_s28 = scalar_lea.vmem [#allocation8], %s1232_s13  ;;  %s1638_s13 = smov [#allocation8]  }
 0x1bb   : > { %v357_v13 = vpop.permute.xlu0 %356  ;;  %v446_v14 = vpop.permute.xlu1 %445 }
 0x1bc   : > { %1294 = vmatpush3.xpose.msk.msra.mxu1 %vm358_vm2, %v357_v13  ;;  %v1037_v13 = vld [vmem:[#allocation7 + $0x8] sm:$0xff] }
 0x1bd   : > { %1298 = vmatprep.subr.mxu1 %v1623_v1 }
 0x1bf   : > { %1296 = vmatmul.mubr.msk.f32.vlgmr.msra.gmra.mrb[0].mxu1 %vm358_vm2, %v1866_v11  ;;  %v524_v23 = vpop.permute.xlu1 %523 }
 0x1c0   : > { %1299 = vmatpush3.msra.mxu1 %v446_v14  ;;  %1300 = vmatprep.mubr.msk.f32.mxu1 %vm1622_vm0, %v1623_v1  ;;  %v1351_v14 = vpack.c.bf16 %v1037_v13, %v1036_v12 }
 0x1c1   : > { %1303 = vmatprep.subr.mxu1 %v1623_v1 }
 0x1c3   : > { %v522_v24 = vpop.permute.xlu1 %521 }
 0x292   : > { %v429_v15 = vpop.f32.mrb[0].mxu1 }
 0x293   : > { %v1297_v16 = vpop.f32.mrb[1].mxu1  ;;  %v433_v17 = vsel %vm358_vm2, %v429_v15, -inf }
 0x294   : > { %434 = vmax.xlane.f32.xlu0 %v433_v17  ;;  %v1039_v16 = vld [vmem:[#allocation7 + $0x18] sm:$0xff] }
 0x2aa   : > { %855 = vrot.lane.b32.xlu0 %v1866_v11, %s1628_s7  ;;  %s1135_s7 = sshll.u32 %s268_s28, 4  ;;  %s1938_s7 = int_to_ptr.vmem [resolvable:$true] %s1135_s7 }
 0x2ab   : > { %s1544_s22 = scalar_lea.vmem %s1938_s7, 128 }
 0x2ac   : > { %p1545_p11 = scmp.ne.s32.totalorder %s1938_s7, %s1544_s22 }
 0x2ae   : > { %p1546_p1 = pnand %p1545_p11, %p2000_p0 }
 0x2b0   : > { %p1547_p3 = pneg %p1546_p1 }
 0x321   : > { %v435_v18 = vpop.xlane.xlu0 %434 }
 0x322   : > { %v436_v19 = vsub.f32 %v429_v15, %v435_v18  ;;  %v1038_v15 = vld [vmem:[#allocation7 + $0x10] sm:$0xff] }
 0x323   : > { %v1354_v17 = vpack.c.bf16 %v1039_v16, %v1038_v15 }
 0x324   : > { %v437_v20 = vmul.f32 1.442695, %v436_v19 }
 0x325   : > { %v856_v28 = vpop.permute.xlu0 %855 }
 0x326   : > { %1442 = vpow2.f32 %v437_v20 }
 0x330   : > { %v1443_v21 = vpop.eup %1442 }
 0x331   : > { %v439_v22 = vsel %vm358_vm2, %v1443_v21, 0.0 }
 0x332   : > { %440 = vadd.xlane.f32.xlu1 %v439_v22 }
 0x343   : > { %689 = vrot.lane.b32.xlu1 %v1866_v11, %s1629_s6 }
 0x347   : > { %687 = vrot.lane.b32.xlu1 %v1866_v11, %s1630_s30 }
 0x34b   : > { %853 = vrot.lane.b32.xlu1 %v1866_v11, %s1631_s15  ;;  %s1936_s15 = scalar_lea.hbm %s1986_s5, %s1253_s11 }
 0x3bf   : > { %v441_v25 = vpop.xlane.xlu1 %440 }
 0x3c0   : > { %1444 = vrcp.f32 %v441_v25 }
 0x3c3   : > { %v690_v26 = vpop.permute.xlu1 %689 }
 0x3c4   : > { %1314 = vmatpush3.xpose.msk.msra.mxu0 %vm358_vm2, %v690_v26 }
 0x3c5   : > { %1323 = vmatprep.subr.mxu0 %v1623_v1 }
 0x3c7   : > { %v688_v27 = vpop.permute.xlu1 %687 }
 0x3c8   : > { %1316 = vmatmul.mubr.msk.f32.vlgmr.msra.gmra.mrb[2].mxu0 %vm358_vm2, %v688_v27 }
 0x3c9   : > { %1324 = vmatpush3.xpose.msk.msra.mxu0 %vm358_vm2, %v856_v28  ;;  %1325 = vmatprep.mubr.msk.f32.mxu0 %vm1622_vm0, %v1623_v1  ;;  %v1250_v28 = vld [vmem:[%s1985_s4] ss:$0 sm:$0xff] }
 0x3ca   : > { %v1445_v29 = vpop.eup %1444  ;;  %1350 = vmatprep.subr.bf16.mxu0 %v1621_v0 }
 0x3cb   : > { %v443_v30 = vmul.f32 0.17677669, %v1445_v29  ;;  %v854_v31 = vpop.permute.xlu1 %853 }
 0x3cc   : > { %1326 = vmatmul.mubr.msk.f32.vlgmr.msra.gmra.mrb[4].mxu0 %vm358_vm2, %v854_v31 }
 0x3cd   : > { %v444_v32 = vmul.f32 %v1443_v21, %v443_v30  ;;  %1341 = vmatprep.mubr.msk.f32.mxu0 %vm1622_vm0, %v1623_v1  ;;  %1352 = vmatpush3.bf16.msra.mxu0 %v1351_v14 }
 0x3ce   : > { %1353 = vmatprep.subr.bf16.mxu0 %v1621_v0 }
 0x3cf   : > { %1301 = vmatmul.mubr.msk.f32.vlgmr.msra.gmra.mrb[2].mxu1 %vm358_vm2, %v444_v32 }
 0x3d0   : > { %1304 = vmatpush3.xpose.msk.msra.mxu1 %vm358_vm2, %v524_v23  ;;  %1305 = vmatprep.mubr.msk.f32.mxu1 %vm1622_vm0, %v1623_v1 }
 0x3d1   : > { %1308 = vmatprep.subr.mxu1 %v1623_v1  ;;  %1355 = vmatpush3.bf16.msra.mxu0 %v1354_v17 }
 0x3d3   : > { %1306 = vmatmul.mubr.msk.f32.vlgmr.msra.gmra.mrb[4].mxu1 %vm358_vm2, %v522_v24 }
 0x3d4   : > { %1310 = vmatprep.mubr.msk.f32.mxu1 %vm1622_vm0, %v1623_v1 }
 0x49b   : > { %v761_v33 = vpop.f32.mrb[2].mxu0 }
 0x49c   : > { %v1317_v34 = vpop.f32.mrb[3].mxu0  ;;  %v765_v35 = vsel %vm358_vm2, %v761_v33, -inf }
 0x49d   : > { %766 = vmax.xlane.f32.xlu0 %v765_v35 }
 0x49f   : > { %v927_v36 = vpop.f32.mrb[4].mxu0 }
 0x4a0   : > { %v1327_v37 = vpop.f32.mrb[5].mxu0  ;;  %v931_v43 = vsel %vm358_vm2, %v927_v36, -inf }
 0x4a2   : > { %v1904_v38 = vpop.f32.mrb[2].mxu1 }
 0x4a3   : > { %v1302_v39 = vpop.f32.mrb[3].mxu1 }
 0x4a6   : > { %v595_v40 = vpop.f32.mrb[4].mxu1 }
 0x4a7   : > { %v1307_v41 = vpop.f32.mrb[5].mxu1  ;;  %v599_v42 = vsel %vm358_vm2, %v595_v40, -inf }
 0x4a8   : > { %600 = vmax.xlane.f32.xlu1 %v599_v42 }
 0x4ac   : > { %932 = vmax.xlane.f32.xlu1 %v931_v43 }
 0x52a   : > { %v767_v44 = vpop.xlane.xlu0 %766 }
 0x52b   : > { %v768_v45 = vsub.f32 %v761_v33, %v767_v44 }
 0x52d   : > { %v769_v46 = vmul.f32 1.442695, %v768_v45 }
 0x52f   : > { %1446 = vpow2.f32 %v769_v46 }
 0x535   : > { %v601_v47 = vpop.xlane.xlu1 %600 }
 0x536   : > { %v602_v55 = vsub.f32 %v595_v40, %v601_v47 }
 0x538   : > { %v603_v56 = vmul.f32 1.442695, %v602_v55 }
 0x539   : > { %v1447_v48 = vpop.eup %1446  ;;  %v933_v49 = vpop.xlane.xlu1 %932 }
 0x53a   : > { %v934_v50 = vsub.f32 %v927_v36, %v933_v49  ;;  %v771_v51 = vsel %vm358_vm2, %v1447_v48, 0.0 }
 0x53b   : > { %772 = vadd.xlane.f32.xlu1 %v771_v51 }
 0x53c   : > { %v935_v52 = vmul.f32 1.442695, %v934_v50 }
 0x53e   : > { %1448 = vpow2.f32 %v935_v52 }
 0x53f   : > { %1450 = vpow2.f32 %v603_v56 }
 0x548   : > { %v1449_v53 = vpop.eup %1448 }
 0x549   : > { %v937_v54 = vsel %vm358_vm2, %v1449_v53, 0.0  ;;  %v1451_v57 = vpop.eup %1450 }
 0x54a   : > { %938 = vadd.xlane.f32.xlu0 %v937_v54  ;;  %v605_v58 = vsel %vm358_vm2, %v1451_v57, 0.0 }
 0x54c   : > { %611 = vrot.lane.b32.xlu1 %v1866_v11, %s1632_s16  ;;  %s1122_s16 = scalar_lea.sflag [#allocation4], %s1838_s12 }
 0x560   : > { %777 = vrot.lane.b32.xlu0 %v1866_v11, %s1633_s9  ;;  %s1548_s9 = sshll.u32 %s1638_s13, 4  ;;  %s1549_s9 = int_to_ptr.vmem [resolvable:$false] %s1548_s9 }
 0x561   : > { %p1551_p7 = scmp.lt.s32.totalorder %s1938_s7, %s1549_s9 }
 0x570   : > { %606 = vadd.xlane.f32.xlu1 %v605_v58 }
 0x581   : > { %943 = vrot.lane.b32.xlu1 %v1866_v11, %s1634_s29  ;;  %s1550_s29 = scalar_lea.vmem %s1549_s9, 256 }
 0x582   : > { %p1552_p9 = scmp.lt.s32.totalorder %s1550_s29, %s1544_s22 }
 0x584   : > { %p1553_p12 = por %p1552_p9, %p1551_p7 }
 0x586   : > { %p1554_p2 = pnand %p1553_p12, %p1547_p3 }
 0x5c8   : > { %v773_v59 = vpop.xlane.xlu1 %772 }
 0x5c9   : > { %1452 = vrcp.f32 %v773_v59 }
 0x5cc   : > { %v612_v60 = vpop.permute.xlu1 %611 }
 0x5cd   : > { %1309 = vmatpush3.msra.mxu1 %v612_v60 }
 0x5ce   : > { %1318 = vmatprep.subr.mxu1 %v1623_v1 }
 0x5d3   : > { %v1453_v63 = vpop.eup %1452 }
 0x5d4   : > { %v775_v4 = vmul.f32 0.17677669, %v1453_v63 }
 0x5d6   : > { %v776_v8 = vmul.f32 %v1447_v48, %v775_v4 }
 0x5d7   : > { %v939_v62 = vpop.xlane.xlu0 %938 }
 0x5db   : > { %v778_v7 = vpop.permute.xlu0 %777 }
 0x5fd   : > { %v607_v61 = vpop.xlane.xlu1 %606 }
 0x5fe   : > { %1454 = vrcp.f32 %v607_v61 }
 0x5ff   : > { %1456 = vrcp.f32 %v939_v62 }
 0x601   : > { %v944_v10 = vpop.permute.xlu1 %943 }
 0x608   : > { %v1455_v2 = vpop.eup %1454 }
 0x609   : > { %v609_v3 = vmul.f32 0.17677669, %v1455_v2  ;;  %v1457_v6 = vpop.eup %1456 }
 0x60a   : > { %v941_v9 = vmul.f32 0.17677669, %v1457_v6 }
 0x60b   : > { %v610_v5 = vmul.f32 %v1451_v57, %v609_v3 }
 0x60c   : > { %v942_v11 = vmul.f32 %v1449_v53, %v941_v9 }
 0x60d   : > { %1311 = vmatmul.mubr.msk.f32.vlgmr.msra.gmra.mrb[6].mxu1 %vm358_vm2, %v610_v5 }
 0x60e   : > { %1319 = vmatpush3.msra.mxu1 %v778_v7  ;;  %1320 = vmatprep.mubr.msk.f32.mxu1 %vm1622_vm0, %v1623_v1 }
 0x60f   : > { %1328 = vmatprep.subr.mxu1 %v1623_v1 }
 0x611   : > { %1321 = vmatmul.mubr.msk.f32.vlgmr.msra.gmra.mrb[8].mxu1 %vm358_vm2, %v776_v8 }
 0x612   : > { %1329 = vmatpush3.msra.mxu1 %v944_v10  ;;  %1330 = vmatprep.mubr.msk.f32.mxu1 %vm1622_vm0, %v1623_v1 }
 0x615   : > { %1331 = vmatmul.mubr.msk.f32.vlgmr.msra.gmra.mrb[10].mxu1 %vm358_vm2, %v942_v11 }
 0x6e0   : > { %v683_v18 = vpop.f32.mrb[6].mxu1 }
 0x6e1   : > { %1020 = vrot.lane.b32.xlu1 %v683_v18, %s1635_s17  ;;  %v1312_v19 = vpop.f32.mrb[7].mxu1 }
 0x6e4   : > { %v849_v20 = vpop.f32.mrb[8].mxu1 }
 0x6e5   : > { %1024 = vrot.lane.b32.xlu0 %v849_v20, %s1636_s24  ;;  %v1322_v1 = vpop.f32.mrb[9].mxu1 }
 0x6e8   : > { %v1015_v21 = vpop.f32.mrb[10].mxu1 }
 0x6e9   : > { %1028 = vrot.lane.b32.xlu1 %v1015_v21, %s1637_s26  ;;  %v1332_v22 = vpop.f32.mrb[11].mxu1 }
 0x753   : > { %v1021_v23 = vpop.permute.xlu1 %1020 }
 0x754   : > { %v1031_v24 = vsel %vm358_vm2, %v1904_v38, %v1021_v23 }
 0x757   : > { %v1025_v0 = vpop.permute.xlu0 %1024 }
 0x758   : > { %v1033_v25 = vsel %vm1032_vm3, %v1031_v24, %v1025_v0 }
 0x75b   : > { %v1029_v26 = vpop.permute.xlu1 %1028 }
 0x75c   : > { %v1035_v27 = vsel %vm1034_vm4, %v1033_v25, %v1029_v26 }
 0x75d   : > { %1342 = vmatmul.mubr.msk.f32.vlgmr.msra.gmra.mrb[6].mxu0 %vm281_vm1, %v1035_v27 }
 0x830   : > { %v1116_v29 = vpop.f32.mrb[6].mxu0 }
 0x831   : > { %v1117_v30 = vadd.f32 %v1250_v28, %v1116_v29  ;;  %v1343_v31 = vpop.f32.mrb[7].mxu0 }
 0x833   : > { %1120 = vst.msk [vmem:[%s268_s28] sm:$0xff] %vm281_vm1, %v1117_v30 }
 0x834   : > { %1557 = shalt.err (!%p1554_p2)
}
 0x835   : > { %s1558_s12 = scalar_lea.hbm %s1936_s15, 128  ;;  %s1562_s26 = scalar_lea.hbm %s1986_s5, 256 }
 0x836   : > { %p1559_p13 = scmp.ne.s32.totalorder %s1936_s15, %s1558_s12  ;;  %p1563_p4 = scmp.lt.u32.totalorder %s1936_s15, %s1986_s5 }
 0x837   : > { %p1564_p5 = scmp.lt.u32.totalorder %s1562_s26, %s1558_s12  ;;  %p1566_p11 = scmp.lt.u32.totalorder %s1558_s12, %s1936_s15 }
 0x838   : > { %p1560_p6 = pnand %p1559_p13, %p2000_p0 }
 0x839   : > { %p1565_p8 = por %p1564_p5, %p1563_p4 }
 0x83a   : > { %p1561_p10 = pneg %p1560_p6 }
 0x83b   : > { %p1567_p1 = por %p1566_p11, %p1565_p8 }
 0x83d   : > { %p1568_p3 = pnand %p1567_p1, %p1561_p10 }
 0x83f   : > { %1571 = shalt.err (!%p1568_p3)
}
 0x840   : > { %1366 = dma.vmem_to_hbm [thread:$0]  (%p2000_p0), %s1938_s7, 128, %s1936_s15, %s1122_s16  }
 0x841 PF: > { %s1147_s11 = sand.u32 1, %s1602_s18   ;;  %p2001_p7 = scmp.ne.s32.totalorder %s1991_s25, 0 }
 0x842   : > { %p2002_p9 = scmp.ge.s32.totalorder %s1614_s21, 2  ;;  %s1148_s28 = scalar_lea.sflag [#allocation4], %s1147_s11 }
 0x844   : > { %p1380_p12 = pnand %p2002_p9, %p2001_p7 }
 0x846   : > { %1597 = dma.done.wait (!%p1380_p12), %s1148_s28, 128  }
 0x847   : > { %1599 = vsyncadd (!%p1380_p12), %s1148_s28, 4294967168  ;;  %p19_p2 = scmp.ge.s32.totalorder %s1779_s14, 4   ;;  %s2003_s18 = smov %s1606_s19 }
 0x848   : > { %s2004_s19 = smov %s1610_s20  ;;  %s2005_s20 = smov %s1795_s27 }
 0x849   : > { %s2006_s21 = smov %s1779_s14  ;;  %21 = sbr.rel (!%p19_p2) target bundleno = 6 (0x6), region = 93 }
 0x850   :  { %1153 = vsyncpa [#allocation3], 1 }
 0x851   :  { %1155 = vsyncpa [#allocation3 + $0x1], 1 }
 0x852   :  { %1156 = vsyncpa [#allocation6], 1 }
 0x853   :  { %1157 = vsyncpa [#allocation4], 1 }
 0x854   :  { %1159 = vsyncpa [#allocation4 + $0x1], 1 }

</bundles_post_ra>
